<compile_context>
chip_gen: v6e
topology: v6e:2x2x1
jax: 0.10.0
libtpu: 0.0.40
codegen_flags: <defaults>
</compile_context>

<pallas_src>
import jax
import jax.numpy as jnp
from jax import lax
from jax.experimental import pallas as pl
from jax.experimental.pallas import tpu as pltpu

NEG_SLOPE = 0.01  # nn.LeakyReLU() and F.leaky_relu default
LANE = 128


def _leaky(v):
    return jnp.where(v > 0, v, NEG_SLOPE * v)


def _round_up(x, m):
    return ((x + m - 1) // m) * m


def _pad_axis(a, axis, target):
    pad = target - a.shape[axis]
    if pad <= 0:
        return a
    widths = [(0, 0)] * a.ndim
    widths[axis] = (0, pad)
    return jnp.pad(a, widths)


def gcn_kernel(x_ref, adj_ref, mask_ref, diag_ref, blk_ref,
               w_in_ref, b_in_ref, w_g_ref, b_g_ref,
               w_h_ref, b_h_ref, w_o_ref, b_o_ref,
               xout_ref):
    bf16, f32 = jnp.bfloat16, jnp.float32
    M, n = adj_ref.shape            # M = b_tile * n flattened node rows
    b_tile = M // n
    n_layers = w_g_ref.shape[0]

    # ---- block-diagonal normalized adjacency --------------------------------
    adj_rows = adj_ref[...]                                   # (M, n) bf16
    # add remaining self loops: 1 on the diagonal wherever the entry is zero
    # (exact 'adj == 0' compare — matches PyG add_remaining_self_loops for
    #  binary adjacency; weighted tiny-nonzero edges would be kept as-is).
    ahat_rows = jnp.where(adj_rows == 0, diag_ref[...], adj_rows)
    a_tiled = (ahat_rows if b_tile == 1
               else jnp.concatenate([ahat_rows] * b_tile, axis=1))  # (M, M)
    bd = a_tiled * blk_ref[...]     # (M, M) bf16 block-diagonal Ahat

    # target-node degrees via MXU dot (column sums), f32 accumulate (exact 0/1)
    ones_col = jnp.ones((M, 1), bf16)
    deg_col = lax.dot_general(bd, ones_col, (((0,), (0,)), ((), ())),
                              preferred_element_type=f32)      # (M, 1)
    dinv_col = jnp.where(deg_col > 0, lax.rsqrt(deg_col), 0.0)  # (M, 1) f32

    # ---- mlp_in_X: Linear + LeakyReLU (bf16 MXU, f32 accumulate) ------------
    h = _leaky(jnp.dot(x_ref[...], w_in_ref[...],
                       preferred_element_type=f32) + b_in_ref[...])  # (M, dx_p)

    # ---- GCNConv layers: out = D^-1/2 Ahat^T D^-1/2 (h W) + b ---------------
    # Ahat^T is folded into dot_general (contract dim 0 vs dim 0); only the
    # (M, dx) activations are scaled by D^-1/2, never the (M, M) matrix.
    for l in range(n_layers):
        hw = jnp.dot(h.astype(bf16), w_g_ref[l],
                     preferred_element_type=f32)               # (M, dx_p)
        hw_s = (dinv_col * hw).astype(bf16)
        agg = lax.dot_general(bd, hw_s, (((0,), (0,)), ((), ())),
                              preferred_element_type=f32)      # (M, dx_p)
        h = _leaky(dinv_col * agg + b_g_ref[l])

    # ---- mlp_out_X: Linear + LeakyReLU + Linear ------------------------------
    h1 = _leaky(jnp.dot(h.astype(bf16), w_h_ref[...],
                        preferred_element_type=f32) + b_h_ref[...])
    xo = jnp.dot(h1.astype(bf16), w_o_ref[...],
                 preferred_element_type=f32) + b_o_ref[...]

    # node mask (in-loop mask and PlaceHolder.mask are idempotent)
    xout_ref[...] = (xo * mask_ref[...]).astype(xout_ref.dtype)


def gcn_forward(X, adj, node_mask, params, b_tile=None):
    bs, n, _, _ = adj.shape
    d_in = X.shape[-1]
    dx = params['w_in'].shape[1]
    d_out = params['w_out'].shape[1]

    d_in_p = _round_up(d_in, LANE)
    dx_p = _round_up(dx, LANE)
    d_out_p = _round_up(d_out, LANE)

    # b_tile: flatten b_tile*n node rows into the matmul M dim, targeting
    # M ≈ 256 (full 256-row MXU pass on v6e/v7x; multiple of 128 on v5e).
    # Tunable; larger bs gives grid >= 2 so the 'parallel' axis can shard
    # across v7x's two TensorCores.
    if b_tile is None:
        target = max(1, 256 // max(n, 1))
        divs = [t for t in range(1, bs + 1) if bs % t == 0]
        b_tile = max([t for t in divs if t <= target] or [1])
    assert bs % b_tile == 0
    if b_tile < bs and (b_tile * n) % 8 != 0:
        b_tile = bs  # full-array blocks are always layout-legal
    M = b_tile * n

    f32, bf16 = jnp.float32, jnp.bfloat16

    # flattened, lane-padded, bf16 activations / adjacency rows
    Xp = _pad_axis(X.astype(bf16), -1, d_in_p).reshape(bs * n, d_in_p)
    adj_rows = adj[..., 0].astype(bf16).reshape(bs * n, n)
    m_col = node_mask.astype(f32).reshape(bs * n, 1)

    # constant 0/1 structure masks (identical for every grid step, so Pallas
    # keeps them resident): self-loop diagonal positions in the stacked-rows
    # layout, and the block-diagonal graph-group mask.
    p_idx = jnp.arange(M, dtype=jnp.int32) % n
    diag_mask = (p_idx[:, None] ==
                 jnp.arange(n, dtype=jnp.int32)[None, :]).astype(bf16)   # (M, n)
    g_idx = jnp.arange(M, dtype=jnp.int32) // n
    block_mask = (g_idx[:, None] == g_idx[None, :]).astype(bf16)         # (M, M)

    # zero-pad weights/biases to lane-dense (multiple-of-128) shapes once;
    # MXU operands bf16, biases f32.
    w_in = _pad_axis(_pad_axis(params['w_in'], 0, d_in_p), 1, dx_p).astype(bf16)
    b_in = _pad_axis(params['b_in'], 1, dx_p).astype(f32)
    w_gcn = _pad_axis(_pad_axis(params['w_gcn'], 1, dx_p), 2, dx_p).astype(bf16)
    b_gcn = _pad_axis(params['b_gcn'], 2, dx_p).astype(f32)
    w_h = _pad_axis(_pad_axis(params['w_h'], 0, dx_p), 1, dx_p).astype(bf16)
    b_h = _pad_axis(params['b_h'], 1, dx_p).astype(f32)
    w_out = _pad_axis(_pad_axis(params['w_out'], 0, dx_p), 1, d_out_p).astype(bf16)
    b_out = _pad_axis(params['b_out'], 1, d_out_p).astype(f32)

    def batch_spec(block_shape):
        return pl.BlockSpec(block_shape, lambda g: (g, 0))

    def const_spec(shape):
        nd = len(shape)
        return pl.BlockSpec(tuple(shape), lambda g, _nd=nd: (0,) * _nd)

    x_out_flat = pl.pallas_call(
        gcn_kernel,
        out_shape=jax.ShapeDtypeStruct((bs * n, d_out_p), jnp.float32),
        grid_spec=pltpu.PrefetchScalarGridSpec(
            num_scalar_prefetch=0,
            grid=(bs // b_tile,),
            in_specs=[
                batch_spec((M, d_in_p)),     # X rows
                batch_spec((M, n)),          # adjacency rows
                batch_spec((M, 1)),          # node mask column
                const_spec(diag_mask.shape),
                const_spec(block_mask.shape),
                const_spec(w_in.shape),
                const_spec(b_in.shape),
                const_spec(w_gcn.shape),
                const_spec(b_gcn.shape),
                const_spec(w_h.shape),
                const_spec(b_h.shape),
                const_spec(w_out.shape),
                const_spec(b_out.shape),
            ],
            out_specs=batch_spec((M, d_out_p)),
        ),
        compiler_params=pltpu.CompilerParams(
            dimension_semantics=("parallel",),
            # tiny footprint today; re-derive if n / b_tile scale (n^2 term
            # hits v7x's 64 MiB first)
            vmem_limit_bytes=32 * 1024 * 1024,
        ),
    )(Xp, adj_rows, m_col, diag_mask, block_mask,
      w_in, b_in, w_gcn, b_gcn, w_h, b_h, w_out, b_out)

    X_out = x_out_flat.reshape(bs, n, d_out_p)[..., :d_out]

    # PlaceHolder(X=X_out, E=adj).mask(node_mask): E = adj * m_i * m_j is pure
    # elementwise on adj — computed in plain XLA in the original dtype.
    m = node_mask.astype(adj.dtype)
    E_out = adj * m[:, :, None, None] * m[:, None, :, None]
    return X_out, E_out


def init_params(key, d_in, dx, d_out, n_layers):
    ks = jax.random.split(key, 7)

    def glorot(k, shape):
        fan_in, fan_out = shape
        lim = jnp.sqrt(6.0 / (fan_in + fan_out))
        return jax.random.uniform(k, shape, jnp.float32, -lim, lim)

    gcn_keys = jax.random.split(ks[2], n_layers)
    return dict(
        w_in=glorot(ks[0], (d_in, dx)),
        b_in=jax.random.uniform(ks[1], (1, dx), jnp.float32, -0.1, 0.1),
        # GCNConv lin weights (xavier, deterministic here); bias init = zeros
        w_gcn=jnp.stack([glorot(k, (dx, dx)) for k in gcn_keys]),
        b_gcn=jnp.zeros((n_layers, 1, dx), jnp.float32),
        w_h=glorot(ks[3], (dx, dx)),
        b_h=jax.random.uniform(ks[4], (1, dx), jnp.float32, -0.1, 0.1),
        w_out=glorot(ks[5], (dx, d_out)),
        b_out=jax.random.uniform(ks[6], (1, d_out), jnp.float32, -0.1, 0.1),
    )


if __name__ == "__main__":
    # TODO(synk): the torch module re-runs xavier_uniform_ on GCN weights every
    # forward with global RNG state; here weights are fixed deterministic.
    bs, n, d_in, dx, d_out, n_layers = 2, 16, 8, 32, 8, 2

    key = jax.random.PRNGKey(0)
    k1, k2, k3 = jax.random.split(key, 3)

    X = jax.random.normal(k1, (bs, n, d_in), jnp.float32)

    # symmetric binary adjacency, no self loops, shape (bs, n, n, 1)
    a = (jax.random.uniform(k2, (bs, n, n)) > 0.5).astype(jnp.float32)
    a = jnp.maximum(a, jnp.transpose(a, (0, 2, 1)))
    a = a * (1.0 - jnp.eye(n, dtype=jnp.float32)[None])
    adj = a[..., None]

    # valid-node mask: 12 nodes in batch 0, 10 in batch 1
    node_mask = (jnp.arange(n)[None, :] <
                 jnp.array([[12], [10]], dtype=jnp.int32)).astype(jnp.float32)

    params = init_params(k3, d_in, dx, d_out, n_layers)

    X_out, E_out = gcn_forward(X, adj, node_mask, params)
    jax.block_until_ready((X_out, E_out))
    assert X_out.shape == (bs, n, d_out) and E_out.shape == (bs, n, n, 1)
    assert bool(jnp.all(jnp.isfinite(X_out)))
    print("KERNEL_OK")
</pallas_src>

<mosaic_0001>
module attributes {stable_mosaic.version = 11 : i64} {
  func.func @gcn_kernel(%arg0: i32, %arg1: memref<32x128xbf16, #tpu.memory_space<vmem>>, %arg2: memref<32x16xbf16, #tpu.memory_space<vmem>>, %arg3: memref<32x1xf32, #tpu.memory_space<vmem>>, %arg4: memref<32x16xbf16, #tpu.memory_space<vmem>>, %arg5: memref<32x32xbf16, #tpu.memory_space<vmem>>, %arg6: memref<128x128xbf16, #tpu.memory_space<vmem>>, %arg7: memref<1x128xf32, #tpu.memory_space<vmem>>, %arg8: memref<2x128x128xbf16, #tpu.memory_space<vmem>>, %arg9: memref<2x1x128xf32, #tpu.memory_space<vmem>>, %arg10: memref<128x128xbf16, #tpu.memory_space<vmem>>, %arg11: memref<1x128xf32, #tpu.memory_space<vmem>>, %arg12: memref<128x128xbf16, #tpu.memory_space<vmem>>, %arg13: memref<1x128xf32, #tpu.memory_space<vmem>>, %arg14: memref<32x128xf32, #tpu.memory_space<vmem>>) attributes {dimension_semantics = [#tpu.dimension_semantics<parallel>], iteration_bounds = array<i64: 1>, scalar_prefetch = 0 : i64, scratch_operands = 0 : i64, tpu.core_type = #tpu.core_type<tc>, window_params = [{transform_indices = @transform_0, window_bounds = array<i64: 32, 128>}, {transform_indices = @transform_1, window_bounds = array<i64: 32, 16>}, {transform_indices = @transform_2, window_bounds = array<i64: 32, 1>}, {pipeline_mode = #tpu.pipeline_mode<synchronous>, transform_indices = @transform_3, window_bounds = array<i64: 32, 16>}, {pipeline_mode = #tpu.pipeline_mode<synchronous>, transform_indices = @transform_4, window_bounds = array<i64: 32, 32>}, {pipeline_mode = #tpu.pipeline_mode<synchronous>, transform_indices = @transform_5, window_bounds = array<i64: 128, 128>}, {pipeline_mode = #tpu.pipeline_mode<synchronous>, transform_indices = @transform_6, window_bounds = array<i64: 1, 128>}, {pipeline_mode = #tpu.pipeline_mode<synchronous>, transform_indices = @transform_7, window_bounds = array<i64: 2, 128, 128>}, {pipeline_mode = #tpu.pipeline_mode<synchronous>, transform_indices = @transform_8, window_bounds = array<i64: 2, 1, 128>}, {pipeline_mode = #tpu.pipeline_mode<synchronous>, transform_indices = @transform_9, window_bounds = array<i64: 128, 128>}, {pipeline_mode = #tpu.pipeline_mode<synchronous>, transform_indices = @transform_10, window_bounds = array<i64: 1, 128>}, {pipeline_mode = #tpu.pipeline_mode<synchronous>, transform_indices = @transform_11, window_bounds = array<i64: 128, 128>}, {pipeline_mode = #tpu.pipeline_mode<synchronous>, transform_indices = @transform_12, window_bounds = array<i64: 1, 128>}, {transform_indices = @transform_13, window_bounds = array<i64: 32, 128>}]} {
    %c0 = arith.constant 0 : index
    %c0_0 = arith.constant 0 : index
    %0 = vector.load %arg2[%c0, %c0_0] : memref<32x16xbf16, #tpu.memory_space<vmem>>, vector<32x16xbf16>
    %cst = arith.constant 0.000000e+00 : bf16
    %1 = vector.broadcast %cst : bf16 to vector<32x16xbf16>
    %2 = arith.cmpf oeq, %0, %1 : vector<32x16xbf16>
    %c0_1 = arith.constant 0 : index
    %c0_2 = arith.constant 0 : index
    %3 = vector.load %arg4[%c0_1, %c0_2] : memref<32x16xbf16, #tpu.memory_space<vmem>>, vector<32x16xbf16>
    %4 = arith.select %2, %3, %0 : vector<32x16xi1>, vector<32x16xbf16>
    %5 = tpu.concatenate %4, %4 in 1 : vector<32x16xbf16>, vector<32x16xbf16> -> vector<32x32xbf16>
    %c0_3 = arith.constant 0 : index
    %c0_4 = arith.constant 0 : index
    %6 = vector.load %arg5[%c0_3, %c0_4] : memref<32x32xbf16, #tpu.memory_space<vmem>>, vector<32x32xbf16>
    %7 = arith.mulf %5, %6 : vector<32x32xbf16>
    %cst_5 = arith.constant 1.000000e+00 : bf16
    %8 = vector.broadcast %cst_5 : bf16 to vector<32x1xbf16>
    %cst_6 = arith.constant dense<0.000000e+00> : vector<32x1xf32>
    %9 = tpu.matmul %7, %8, %cst_6 {dimension_numbers = #tpu.dot_dimension_numbers<[0], [0], [1], [1], [0, 1, 1, 1], [], []>} : vector<32x32xbf16>, vector<32x1xbf16>, vector<32x1xf32> -> vector<32x1xf32>
    %cst_7 = arith.constant 0.000000e+00 : f32
    %10 = vector.broadcast %cst_7 : f32 to vector<32x1xf32>
    %11 = arith.cmpf ogt, %9, %10 : vector<32x1xf32>
    %12 = math.rsqrt %9 : vector<32x1xf32>
    %cst_8 = arith.constant 0.000000e+00 : f32
    %13 = vector.broadcast %cst_8 : f32 to vector<32x1xf32>
    %14 = arith.select %11, %12, %13 : vector<32x1xi1>, vector<32x1xf32>
    %c0_9 = arith.constant 0 : index
    %c0_10 = arith.constant 0 : index
    %15 = vector.load %arg1[%c0_9, %c0_10] : memref<32x128xbf16, #tpu.memory_space<vmem>>, vector<32x128xbf16>
    %c0_11 = arith.constant 0 : index
    %c0_12 = arith.constant 0 : index
    %16 = vector.load %arg6[%c0_11, %c0_12] : memref<128x128xbf16, #tpu.memory_space<vmem>>, vector<128x128xbf16>
    %cst_13 = arith.constant dense<0.000000e+00> : vector<32x128xf32>
    %17 = tpu.matmul %15, %16, %cst_13 {dimension_numbers = #tpu.dot_dimension_numbers<[1], [0], [0], [1], [0, 0, 1, 1], [], []>} : vector<32x128xbf16>, vector<128x128xbf16>, vector<32x128xf32> -> vector<32x128xf32>
    %c0_14 = arith.constant 0 : index
    %c0_15 = arith.constant 0 : index
    %18 = vector.load %arg7[%c0_14, %c0_15] : memref<1x128xf32, #tpu.memory_space<vmem>>, vector<1x128xf32>
    %19 = vector.broadcast %18 : vector<1x128xf32> to vector<32x128xf32>
    %20 = arith.addf %17, %19 : vector<32x128xf32>
    %cst_16 = arith.constant 0.000000e+00 : f32
    %21 = vector.broadcast %cst_16 : f32 to vector<32x128xf32>
    %22 = arith.cmpf ogt, %20, %21 : vector<32x128xf32>
    %cst_17 = arith.constant 0.00999999977 : f32
    %23 = vector.broadcast %cst_17 : f32 to vector<32x128xf32>
    %24 = arith.mulf %23, %20 : vector<32x128xf32>
    %25 = arith.select %22, %20, %24 : vector<32x128xi1>, vector<32x128xf32>
    %26 = arith.truncf %25 : vector<32x128xf32> to vector<32x128xbf16>
    %c0_18 = arith.constant 0 : index
    %c0_19 = arith.constant 0 : index
    %c0_20 = arith.constant 0 : index
    %27 = vector.load %arg8[%c0_18, %c0_19, %c0_20] : memref<2x128x128xbf16, #tpu.memory_space<vmem>>, vector<1x128x128xbf16>
    %28 = vector.shape_cast %27 : vector<1x128x128xbf16> to vector<128x128xbf16>
    %cst_21 = arith.constant dense<0.000000e+00> : vector<32x128xf32>
    %29 = tpu.matmul %26, %28, %cst_21 {dimension_numbers = #tpu.dot_dimension_numbers<[1], [0], [0], [1], [0, 0, 1, 1], [], []>} : vector<32x128xbf16>, vector<128x128xbf16>, vector<32x128xf32> -> vector<32x128xf32>
    %30 = vector.broadcast %14 : vector<32x1xf32> to vector<32x128xf32>
    %31 = arith.mulf %30, %29 : vector<32x128xf32>
    %32 = arith.truncf %31 : vector<32x128xf32> to vector<32x128xbf16>
    %cst_22 = arith.constant dense<0.000000e+00> : vector<32x128xf32>
    %33 = tpu.matmul %7, %32, %cst_22 {dimension_numbers = #tpu.dot_dimension_numbers<[0], [0], [1], [1], [0, 1, 1, 1], [], []>} : vector<32x32xbf16>, vector<32x128xbf16>, vector<32x128xf32> -> vector<32x128xf32>
    %34 = vector.broadcast %14 : vector<32x1xf32> to vector<32x128xf32>
    %35 = arith.mulf %34, %33 : vector<32x128xf32>
    %c0_23 = arith.constant 0 : index
    %c0_24 = arith.constant 0 : index
    %c0_25 = arith.constant 0 : index
    %36 = vector.load %arg9[%c0_23, %c0_24, %c0_25] : memref<2x1x128xf32, #tpu.memory_space<vmem>>, vector<1x1x128xf32>
    %37 = vector.shape_cast %36 : vector<1x1x128xf32> to vector<1x128xf32>
    %38 = vector.broadcast %37 : vector<1x128xf32> to vector<32x128xf32>
    %39 = arith.addf %35, %38 : vector<32x128xf32>
    %cst_26 = arith.constant 0.000000e+00 : f32
    %40 = vector.broadcast %cst_26 : f32 to vector<32x128xf32>
    %41 = arith.cmpf ogt, %39, %40 : vector<32x128xf32>
    %cst_27 = arith.constant 0.00999999977 : f32
    %42 = vector.broadcast %cst_27 : f32 to vector<32x128xf32>
    %43 = arith.mulf %42, %39 : vector<32x128xf32>
    %44 = arith.select %41, %39, %43 : vector<32x128xi1>, vector<32x128xf32>
    %45 = arith.truncf %44 : vector<32x128xf32> to vector<32x128xbf16>
    %c1 = arith.constant 1 : index
    %c0_28 = arith.constant 0 : index
    %c0_29 = arith.constant 0 : index
    %46 = vector.load %arg8[%c1, %c0_28, %c0_29] : memref<2x128x128xbf16, #tpu.memory_space<vmem>>, vector<1x128x128xbf16>
    %47 = vector.shape_cast %46 : vector<1x128x128xbf16> to vector<128x128xbf16>
    %cst_30 = arith.constant dense<0.000000e+00> : vector<32x128xf32>
    %48 = tpu.matmul %45, %47, %cst_30 {dimension_numbers = #tpu.dot_dimension_numbers<[1], [0], [0], [1], [0, 0, 1, 1], [], []>} : vector<32x128xbf16>, vector<128x128xbf16>, vector<32x128xf32> -> vector<32x128xf32>
    %49 = vector.broadcast %14 : vector<32x1xf32> to vector<32x128xf32>
    %50 = arith.mulf %49, %48 : vector<32x128xf32>
    %51 = arith.truncf %50 : vector<32x128xf32> to vector<32x128xbf16>
    %cst_31 = arith.constant dense<0.000000e+00> : vector<32x128xf32>
    %52 = tpu.matmul %7, %51, %cst_31 {dimension_numbers = #tpu.dot_dimension_numbers<[0], [0], [1], [1], [0, 1, 1, 1], [], []>} : vector<32x32xbf16>, vector<32x128xbf16>, vector<32x128xf32> -> vector<32x128xf32>
    %53 = vector.broadcast %14 : vector<32x1xf32> to vector<32x128xf32>
    %54 = arith.mulf %53, %52 : vector<32x128xf32>
    %c1_32 = arith.constant 1 : index
    %c0_33 = arith.constant 0 : index
    %c0_34 = arith.constant 0 : index
    %55 = vector.load %arg9[%c1_32, %c0_33, %c0_34] : memref<2x1x128xf32, #tpu.memory_space<vmem>>, vector<1x1x128xf32>
    %56 = vector.shape_cast %55 : vector<1x1x128xf32> to vector<1x128xf32>
    %57 = vector.broadcast %56 : vector<1x128xf32> to vector<32x128xf32>
    %58 = arith.addf %54, %57 : vector<32x128xf32>
    %cst_35 = arith.constant 0.000000e+00 : f32
    %59 = vector.broadcast %cst_35 : f32 to vector<32x128xf32>
    %60 = arith.cmpf ogt, %58, %59 : vector<32x128xf32>
    %cst_36 = arith.constant 0.00999999977 : f32
    %61 = vector.broadcast %cst_36 : f32 to vector<32x128xf32>
    %62 = arith.mulf %61, %58 : vector<32x128xf32>
    %63 = arith.select %60, %58, %62 : vector<32x128xi1>, vector<32x128xf32>
    %64 = arith.truncf %63 : vector<32x128xf32> to vector<32x128xbf16>
    %c0_37 = arith.constant 0 : index
    %c0_38 = arith.constant 0 : index
    %65 = vector.load %arg10[%c0_37, %c0_38] : memref<128x128xbf16, #tpu.memory_space<vmem>>, vector<128x128xbf16>
    %cst_39 = arith.constant dense<0.000000e+00> : vector<32x128xf32>
    %66 = tpu.matmul %64, %65, %cst_39 {dimension_numbers = #tpu.dot_dimension_numbers<[1], [0], [0], [1], [0, 0, 1, 1], [], []>} : vector<32x128xbf16>, vector<128x128xbf16>, vector<32x128xf32> -> vector<32x128xf32>
    %c0_40 = arith.constant 0 : index
    %c0_41 = arith.constant 0 : index
    %67 = vector.load %arg11[%c0_40, %c0_41] : memref<1x128xf32, #tpu.memory_space<vmem>>, vector<1x128xf32>
    %68 = vector.broadcast %67 : vector<1x128xf32> to vector<32x128xf32>
    %69 = arith.addf %66, %68 : vector<32x128xf32>
    %cst_42 = arith.constant 0.000000e+00 : f32
    %70 = vector.broadcast %cst_42 : f32 to vector<32x128xf32>
    %71 = arith.cmpf ogt, %69, %70 : vector<32x128xf32>
    %cst_43 = arith.constant 0.00999999977 : f32
    %72 = vector.broadcast %cst_43 : f32 to vector<32x128xf32>
    %73 = arith.mulf %72, %69 : vector<32x128xf32>
    %74 = arith.select %71, %69, %73 : vector<32x128xi1>, vector<32x128xf32>
    %75 = arith.truncf %74 : vector<32x128xf32> to vector<32x128xbf16>
    %c0_44 = arith.constant 0 : index
    %c0_45 = arith.constant 0 : index
    %76 = vector.load %arg12[%c0_44, %c0_45] : memref<128x128xbf16, #tpu.memory_space<vmem>>, vector<128x128xbf16>
    %cst_46 = arith.constant dense<0.000000e+00> : vector<32x128xf32>
    %77 = tpu.matmul %75, %76, %cst_46 {dimension_numbers = #tpu.dot_dimension_numbers<[1], [0], [0], [1], [0, 0, 1, 1], [], []>} : vector<32x128xbf16>, vector<128x128xbf16>, vector<32x128xf32> -> vector<32x128xf32>
    %c0_47 = arith.constant 0 : index
    %c0_48 = arith.constant 0 : index
    %78 = vector.load %arg13[%c0_47, %c0_48] : memref<1x128xf32, #tpu.memory_space<vmem>>, vector<1x128xf32>
    %79 = vector.broadcast %78 : vector<1x128xf32> to vector<32x128xf32>
    %80 = arith.addf %77, %79 : vector<32x128xf32>
    %c0_49 = arith.constant 0 : index
    %c0_50 = arith.constant 0 : index
    %81 = vector.load %arg3[%c0_49, %c0_50] : memref<32x1xf32, #tpu.memory_space<vmem>>, vector<32x1xf32>
    %82 = vector.broadcast %81 : vector<32x1xf32> to vector<32x128xf32>
    %83 = arith.mulf %80, %82 : vector<32x128xf32>
    %c0_51 = arith.constant 0 : index
    %c0_52 = arith.constant 0 : index
    %84 = vector.load %arg14[%c0_51, %c0_52] : memref<32x128xf32, #tpu.memory_space<vmem>>, vector<32x128xf32>
    tpu.vector_store %arg14[%c0_51, %c0_52], %83 {strides = array<i32>} : memref<32x128xf32, #tpu.memory_space<vmem>>, vector<32x128xf32>,
    return
  }
  func.func @transform_0(%arg0: i32) -> (i32, i32) {
    %c0_i32 = arith.constant 0 : i32
    %c0_i32_0 = arith.constant 0 : i32
    return %arg0, %c0_i32 : i32, i32
  }
  func.func @transform_1(%arg0: i32) -> (i32, i32) {
    %c0_i32 = arith.constant 0 : i32
    %c0_i32_0 = arith.constant 0 : i32
    return %arg0, %c0_i32 : i32, i32
  }
  func.func @transform_2(%arg0: i32) -> (i32, i32) {
    %c0_i32 = arith.constant 0 : i32
    %c0_i32_0 = arith.constant 0 : i32
    return %arg0, %c0_i32 : i32, i32
  }
  func.func @transform_3(%arg0: i32) -> (i32, i32) {
    %c0_i32 = arith.constant 0 : i32
    %c0_i32_0 = arith.constant 0 : i32
    %c0_i32_1 = arith.constant 0 : i32
    return %c0_i32, %c0_i32_0 : i32, i32
  }
  func.func @transform_4(%arg0: i32) -> (i32, i32) {
    %c0_i32 = arith.constant 0 : i32
    %c0_i32_0 = arith.constant 0 : i32
    %c0_i32_1 = arith.constant 0 : i32
    return %c0_i32, %c0_i32_0 : i32, i32
  }
  func.func @transform_5(%arg0: i32) -> (i32, i32) {
    %c0_i32 = arith.constant 0 : i32
    %c0_i32_0 = arith.constant 0 : i32
    %c0_i32_1 = arith.constant 0 : i32
    return %c0_i32, %c0_i32_0 : i32, i32
  }
  func.func @transform_6(%arg0: i32) -> (i32, i32) {
    %c0_i32 = arith.constant 0 : i32
    %c0_i32_0 = arith.constant 0 : i32
    %c0_i32_1 = arith.constant 0 : i32
    return %c0_i32, %c0_i32_0 : i32, i32
  }
  func.func @transform_7(%arg0: i32) -> (i32, i32, i32) {
    %c0_i32 = arith.constant 0 : i32
    %c0_i32_0 = arith.constant 0 : i32
    %c0_i32_1 = arith.constant 0 : i32
    %c0_i32_2 = arith.constant 0 : i32
    return %c0_i32, %c0_i32_0, %c0_i32_1 : i32, i32, i32
  }
  func.func @transform_8(%arg0: i32) -> (i32, i32, i32) {
    %c0_i32 = arith.constant 0 : i32
    %c0_i32_0 = arith.constant 0 : i32
    %c0_i32_1 = arith.constant 0 : i32
    %c0_i32_2 = arith.constant 0 : i32
    return %c0_i32, %c0_i32_0, %c0_i32_1 : i32, i32, i32
  }
  func.func @transform_9(%arg0: i32) -> (i32, i32) {
    %c0_i32 = arith.constant 0 : i32
    %c0_i32_0 = arith.constant 0 : i32
    %c0_i32_1 = arith.constant 0 : i32
    return %c0_i32, %c0_i32_0 : i32, i32
  }
  func.func @transform_10(%arg0: i32) -> (i32, i32) {
    %c0_i32 = arith.constant 0 : i32
    %c0_i32_0 = arith.constant 0 : i32
    %c0_i32_1 = arith.constant 0 : i32
    return %c0_i32, %c0_i32_0 : i32, i32
  }
  func.func @transform_11(%arg0: i32) -> (i32, i32) {
    %c0_i32 = arith.constant 0 : i32
    %c0_i32_0 = arith.constant 0 : i32
    %c0_i32_1 = arith.constant 0 : i32
    return %c0_i32, %c0_i32_0 : i32, i32
  }
  func.func @transform_12(%arg0: i32) -> (i32, i32) {
    %c0_i32 = arith.constant 0 : i32
    %c0_i32_0 = arith.constant 0 : i32
    %c0_i32_1 = arith.constant 0 : i32
    return %c0_i32, %c0_i32_0 : i32, i32
  }
  func.func @transform_13(%arg0: i32) -> (i32, i32) {
    %c0_i32 = arith.constant 0 : i32
    %c0_i32_0 = arith.constant 0 : i32
    return %arg0, %c0_i32 : i32, i32
  }
}

</mosaic_0001>

<bundles_post_ra>
// kernel: tpu_custom_call.1
= control target key start
LH: loop header
LB: loop body
LE: loop exit
PB: predicated region body
PF: predicated region fallthrough
CT: control target
= control target key end

     0   :  { %18 = vsyncpa [#allocation3], 0  ;;  %s1762_s0 = inlined_call_operand.vmem [shape: bf16[32,128], index: 0, kind: input, shape index: {}]   ;;  %s1763_s1 = inlined_call_operand.vmem [shape: bf16[32,16], index: 1, kind: input, shape index: {}]   ;;  %s1764_s2 = inlined_call_operand.vmem [shape: f32[32,1], index: 2, kind: input, shape index: {}]   ;;  %s1765_s3 = inlined_call_operand.vmem [shape: bf16[32,16], index: 3, kind: input, shape index: {}]   ;;  %s1766_s4 = inlined_call_operand.hbm [shape: bf16[32,32], index: 4, kind: input, shape index: {}]   ;;  %s1767_s5 = inlined_call_operand.vmem [shape: bf16[128,128], index: 5, kind: input, shape index: {}]   ;;  %s1768_s6 = inlined_call_operand.vmem [shape: f32[1,128], index: 6, kind: input, shape index: {}]   ;;  %s1769_s7 = inlined_call_operand.hbm [shape: bf16[2,128,128], index: 7, kind: input, shape index: {}]   ;;  %s1770_s8 = inlined_call_operand.vmem [shape: f32[2,1,128], index: 8, kind: input, shape index: {}]   ;;  %s1771_s9 = inlined_call_operand.hbm [shape: bf16[128,128], index: 9, kind: input, shape index: {}]   ;;  %s1772_s10 = inlined_call_operand.vmem [shape: f32[1,128], index: 10, kind: input, shape index: {}]   ;;  %s1773_s11 = inlined_call_operand.hbm [shape: bf16[128,128], index: 11, kind: input, shape index: {}]   ;;  %s1774_s12 = inlined_call_operand.vmem [shape: f32[1,128], index: 12, kind: input, shape index: {}]   ;;  %s1775_s13 = inlined_call_operand.hbm [shape: f32[32,128], index: 13, kind: output, shape index: {}]  }
   0x1   :  { %19 = vsyncpa [#allocation6], 0 }
   0x2   :  { %20 = vsyncpa [#allocation9], 0 }
   0x3   :  { %21 = vsyncpa [#allocation4], 0  ;;  %s1532_s25 = smov [#allocation5]   ;;  %s1533_s27 = smov [#allocation2]  }
   0x4   :  { %s51_s26 = sshll.u32 %s1532_s25, 4  ;;  %s35_s28 = sshll.u32 %s1533_s27, 4  ;;  %s52_s26 = int_to_ptr.vmem [resolvable:$true] %s51_s26  ;;  %s36_s28 = int_to_ptr.vmem [resolvable:$true] %s35_s28 }
   0x5   :  { %s1432_s29 = scalar_lea.vmem %s52_s26, 2048  ;;  %p1437_p1 = scmp.lt.s32.totalorder %s52_s26, %s52_s26 }
   0x6   :  { %p1433_p0 = scmp.ne.s32.totalorder %s52_s26, %s1432_s29  ;;  %p1438_p2 = scmp.lt.s32.totalorder %s1432_s29, %s1432_s29 }
   0x8   :  { %p1439_p3 = por %p1438_p2, %p1437_p1 }
   0xa   :  { %p1440_p4 = pnand %p1439_p3, %p1433_p0 }
   0xc   :  { %1443 = shalt.err (!%p1440_p4)
}
   0xd   :  { %s1534_s30 = smov 64   ;;  %s1535_s14 = smov 4  }
   0xe   :  { %57 = dma.hbm_to_vmem [thread:$0]  %s1769_s7, 2048, %s52_s26, [#allocation6], %s1534_s30, %s1534_s30, %s1535_s14  }
   0xf   :  { %s1452_s17 = scalar_lea.vmem %s36_s28, 256  ;;  %p1457_p6 = scmp.lt.s32.totalorder %s36_s28, %s36_s28 }
  0x10   :  { %p1453_p5 = scmp.ne.s32.totalorder %s36_s28, %s1452_s17  ;;  %p1458_p7 = scmp.lt.s32.totalorder %s1452_s17, %s1452_s17 }
  0x12   :  { %p1459_p8 = por %p1458_p7, %p1457_p6 }
  0x14   :  { %p1460_p9 = pnand %p1459_p8, %p1453_p5 }
  0x16   :  { %1463 = shalt.err (!%p1460_p9)
}
  0x17   :  { %41 = dma.hbm_to_vmem [thread:$0]  %s1766_s4, 256, %s36_s28, [#allocation3], %s1534_s30, %s1534_s30, %s1535_s14  }
  0x18   :  { %s1536_s20 = smov [#allocation7]   ;;  %s1537_s22 = smov [#allocation8]  }
  0x19   :  { %s65_s21 = sshll.u32 %s1536_s20, 4  ;;  %s79_s23 = sshll.u32 %s1537_s22, 4  ;;  %s66_s21 = int_to_ptr.vmem [resolvable:$true] %s65_s21  ;;  %s80_s23 = int_to_ptr.vmem [resolvable:$true] %s79_s23 }
  0x1a   :  { %s1472_s7 = scalar_lea.vmem %s66_s21, 1024  ;;  %p1477_p11 = scmp.lt.s32.totalorder %s66_s21, %s66_s21 }
  0x1b   :  { %p1473_p10 = scmp.ne.s32.totalorder %s66_s21, %s1472_s7  ;;  %p1478_p12 = scmp.lt.s32.totalorder %s1472_s7, %s1472_s7 }
  0x1d   :  { %p1479_p13 = por %p1478_p12, %p1477_p11 }
  0x1f   :  { %p1480_p0 = pnand %p1479_p13, %p1473_p10 }
  0x21   :  { %1483 = shalt.err (!%p1480_p0)
}
  0x22   :  { %71 = dma.hbm_to_vmem [thread:$0]  %s1771_s9, 1024, %s66_s21, [#allocation6], %s1534_s30, %s1534_s30, %s1535_s14  }
  0x23   :  { %s1492_s4 = scalar_lea.vmem %s80_s23, 1024  ;;  %p1497_p2 = scmp.lt.s32.totalorder %s80_s23, %s80_s23 }
  0x24   :  { %p1493_p1 = scmp.ne.s32.totalorder %s80_s23, %s1492_s4  ;;  %p1498_p3 = scmp.lt.s32.totalorder %s1492_s4, %s1492_s4 }
  0x26   :  { %p1499_p4 = por %p1498_p3, %p1497_p2 }
  0x28   :  { %p1500_p5 = pnand %p1499_p4, %p1493_p1 }
  0x2a   :  { %1503 = shalt.err (!%p1500_p5)
}
  0x2b   :  { %85 = dma.hbm_to_vmem [thread:$0]  %s1773_s11, 1024, %s80_s23, [#allocation9], %s1534_s30, %s1534_s30, %s1535_s14  }
  0x2c   :  { %1524 = dma.done.wait [#allocation3], 256  }
  0x2d   :  { %1525 = vsyncadd [#allocation3], 4294967040 }
  0x2e   :  { %1526 = dma.done.wait [#allocation6], 3072  }
  0x2f   :  { %1527 = vsyncadd [#allocation6], 4294964224 }
  0x30   :  { %1528 = dma.done.wait [#allocation9], 1024  }
  0x31   :  { %1529 = vsyncadd [#allocation9], 4294966272  ;;  %v102_v0 = vld [vmem:[%s1763_s1] sm:$0xf]  ;;  %v103_v1 = vld [vmem:[%s1763_s1 + $0x4] sm:$0xf] }
  0x32   :  { %v110_v2 = vld [vmem:[%s1765_s3] sm:$0xf]  ;;  %v1538_v3 = vmov 1065369472   ;;  %vm106_vm0 = vcmp.eq.bf16.partialorder %v102_v0, 0  ;;  %vm107_vm1 = vcmp.eq.bf16.partialorder %v103_v1, 0 }
  0x33   :  { %1234 = vmatprep.subr.bf16.mxu1 %v1538_v3  ;;  %v111_v4 = vld [vmem:[%s1765_s3 + $0x4] sm:$0xf]  ;;  %v104_v5 = vld [vmem:[%s1763_s1 + $0x8] sm:$0xf]  ;;  %v114_v6 = vsel %vm106_vm0, %v110_v2, %v102_v0  ;;  %v105_v8 = vld [vmem:[%s1763_s1 + $0xc] sm:$0xf] }
  0x34   :  { %1235 = vmatpush3.bf16.msra.mxu1 %v1538_v3  ;;  %v115_v7 = vsel %vm107_vm1, %v111_v4, %v103_v1  ;;  %vm108_vm2 = vcmp.eq.bf16.partialorder %v104_v5, 0  ;;  %v112_v9 = vld [vmem:[%s1765_s3 + $0x8] sm:$0xf]  ;;  %vm109_vm3 = vcmp.eq.bf16.partialorder %v105_v8, 0  ;;  %v113_v11 = vld [vmem:[%s1765_s3 + $0xc] sm:$0xf] }
  0x35   :  { %1236 = vmatprep.subr.bf16.mxu1 %v1538_v3  ;;  %v1114_v10 = vcombine.low %v114_v6, %v115_v7  ;;  %v116_v12 = vsel %vm108_vm2, %v112_v9, %v104_v5  ;;  %v117_v13 = vsel %vm109_vm3, %v113_v11, %v105_v8  ;;  %s1539_s24 = smov 16   ;;  %v1374_v15 = vld [vmem:[%s1767_s5 + $0x38] sm:$0xff]   ;;  %vm132_vm4 = vcmask 130048   ;;  %v1372_v16 = vld [vmem:[#allocation2] sm:$0xff]   ;;  %v1373_v20 = vld [vmem:[#allocation2 + $0x8] sm:$0xff]   ;;  %s1541_s15 = smov [#allocation10]  }
  0x36   :  { %v1115_v14 = vcombine.low %v116_v12, %v117_v13  ;;  %vm175_vm5 = vcmask 261120   ;;  %v1382_v25 = vld [vmem:[%s1762_s0] sm:$0xff]   ;;  %v1375_v26 = vld [vmem:[%s1767_s5 + $0x30] sm:$0xff]   ;;  %v1376_v28 = vld [vmem:[%s1767_s5 + $0x28] sm:$0xff]   ;;  %v1540_v36 = vmov 0   ;;  %s1100_s16 = sshll.u32 %s1541_s15, 4  ;;  %s1101_s16 = int_to_ptr.vmem [resolvable:$true] %s1100_s16 }
  0x37   :  { %128 = vrot.lane.b32.xlu0 %v1114_v10, %s1539_s24  ;;  %v1377_v29 = vld [vmem:[%s1767_s5 + $0x20] sm:$0xff]   ;;  %v1378_v30 = vld [vmem:[%s1767_s5 + $0x18] sm:$0xff]   ;;  %v1379_v31 = vld [vmem:[%s1767_s5 + $0x10] sm:$0xff]   ;;  %p1509_p7 = scmp.lt.s32.totalorder %s1101_s16, %s1101_s16 }
  0x38   :  { %1237 = vmatpush3.bf16.msra.mxu1 %v1538_v3  ;;  %v1380_v32 = vld [vmem:[%s1767_s5 + $0x8] sm:$0xff]   ;;  %v1381_v33 = vld [vmem:[%s1767_s5] sm:$0xff]   ;;  %1370 = vset.pattern.permute.xlu0 %v1540_v36  ;;  %v1386_v38 = vld [vmem:[#allocation5 + $0x28] sm:$0xff]  }
  0x39   :  { %1242 = vmatprep.subr.bf16.mxu1 %v1374_v15  ;;  %v1383_v34 = vld [vmem:[%s1762_s0 + $0x8] sm:$0xff]   ;;  %v1385_v37 = vld [vmem:[#allocation5 + $0x30] sm:$0xff]   ;;  %v1387_v39 = vld [vmem:[#allocation5 + $0x20] sm:$0xff]  }
  0x3a   :  { %v1384_v35 = vld [vmem:[#allocation5 + $0x38] sm:$0xff]   ;;  %v1389_v41 = vld [vmem:[#allocation5 + $0x10] sm:$0xff]   ;;  %v1390_v42 = vld [vmem:[#allocation5 + $0x8] sm:$0xff]  }
  0x3b   :  { %130 = vrot.lane.b32.xlu0 %v1115_v14, %s1539_s24  ;;  %1262 = vmatprep.subr.bf16.mxu0 %v1384_v35  ;;  %v1388_v40 = vld [vmem:[#allocation5 + $0x18] sm:$0xff]   ;;  %v1391_v43 = vld [vmem:[#allocation5] sm:$0xff]   ;;  %v1063_v57 = vld [vmem:[%s1764_s2] sm:$0xff] }
  0x3c   :  { %1263 = vmatpush3.bf16.msra.mxu0 %v1384_v35  ;;  %v1064_v56 = vld [vmem:[%s1764_s2 + $0x8] sm:$0xff]  ;;  %v1066_v58 = vld [vmem:[%s1764_s2 + $0x18] sm:$0xff]  ;;  %v1065_v59 = vld [vmem:[%s1764_s2 + $0x10] sm:$0xff] }
  0x3d   :  { %1264 = vmatprep.subr.bf16.mxu0 %v1385_v37  ;;  %v1120_v61 = vld [vmem:[%s1768_s6] ss:$0 sm:$0xff]  ;;  %v1396_v35 = vld [vmem:[#allocation5 + $0x58] sm:$0xff]  }
  0x40   :  { %1265 = vmatpush3.bf16.msra.mxu0 %v1385_v37  ;;  %v1398_v37 = vld [vmem:[#allocation5 + $0x48] sm:$0xff]  }
  0x41   :  { %1266 = vmatprep.subr.bf16.mxu0 %v1386_v38 }
  0x44   :  { %1267 = vmatpush3.bf16.msra.mxu0 %v1386_v38  ;;  %v1399_v38 = vld [vmem:[#allocation5 + $0x40] sm:$0xff]  }
  0x45   :  { %1268 = vmatprep.subr.bf16.mxu0 %v1387_v39 }
  0x48   :  { %1269 = vmatpush3.bf16.msra.mxu0 %v1387_v39 }
  0x49   :  { %1270 = vmatprep.subr.bf16.mxu0 %v1388_v40 }
  0x4c   :  { %1271 = vmatpush3.bf16.msra.mxu0 %v1388_v40 }
  0x4d   :  { %1272 = vmatprep.subr.bf16.mxu0 %v1389_v41 }
  0x50   :  { %1273 = vmatpush3.bf16.msra.mxu0 %v1389_v41 }
  0x51   :  { %1274 = vmatprep.subr.bf16.mxu0 %v1390_v42 }
  0x54   :  { %1275 = vmatpush3.bf16.msra.mxu0 %v1390_v42 }
  0x55   :  { %1276 = vmatprep.subr.bf16.mxu0 %v1391_v43 }
  0x58   :  { %1277 = vmatpush3.bf16.msra.mxu0 %v1391_v43 }
  0xa9   :  { %v129_v17 = vpop.permute.xlu0 %128 }
  0xaa   :  { %v135_v18 = vsel %vm132_vm4, %v1114_v10, %v129_v17  ;;  %v1394_v17 = vld [vmem:[#allocation5 + $0x68] sm:$0xff]  }
  0xab   :  { %v157_v19 = vmul.bf16 %v1372_v16, %v135_v18  ;;  %v1393_v16 = vld [vmem:[#allocation5 + $0x70] sm:$0xff]   ;;  %v1395_v18 = vld [vmem:[#allocation5 + $0x60] sm:$0xff]  }
  0xad   :  { %159 = vxpose.xlu1.c.b16.start [1/2] (short) (narrow) %v157_v19, 32  ;;  %v131_v21 = vpop.permute.xlu0 %130 }
  0xae   :  { %v139_v22 = vsel %vm132_vm4, %v1115_v14, %v131_v21 }
  0xaf   :  { %v158_v23 = vmul.bf16 %v1373_v20, %v139_v22 }
  0xb1   :  { %160 = vxpose.xlu1.c.b16.end [2/2] (short) (narrow) %v158_v23, 32 }
  0xb5   :  { %1371 = vset.pattern.permute.xlu1 %v1540_v36  ;;  %v1397_v36 = vld [vmem:[#allocation5 + $0x50] sm:$0xff]  }
 0x10f   :  { %v1665_v24 = vpop.trf.xlu1 }
 0x110   :  { %1238 = vmatprep.mubr.msk.bf16.mxu1 %vm175_vm5, %v1665_v24 }
 0x113   :  { %v1675_v27 = vpop.trf.xlu1 }
 0x114   :  { %1239 = vmatmul.mubr.msk.bf16.vlgmr.msra.gmra.mxu1 %vm175_vm5, %v1675_v27 }
 0x115   :  { %1243 = vmatpush3.bf16.msra.mxu1 %v1374_v15  ;;  %1258 = vmatprep.mubr.bf16.mxu1 %v1382_v25  ;;  %v1392_v15 = vld [vmem:[#allocation5 + $0x78] sm:$0xff]  }
 0x116   :  { %1244 = vmatprep.subr.bf16.mxu1 %v1375_v26  ;;  %1290 = vmatprep.subr.bf16.mxu0 %v1392_v15 }
 0x119   :  { %1245 = vmatpush3.bf16.msra.mxu1 %v1375_v26 }
 0x11a   :  { %1246 = vmatprep.subr.bf16.mxu1 %v1376_v28 }
 0x11d   :  { %1247 = vmatpush3.bf16.msra.mxu1 %v1376_v28 }
 0x11e   :  { %1248 = vmatprep.subr.bf16.mxu1 %v1377_v29 }
 0x121   :  { %1249 = vmatpush3.bf16.msra.mxu1 %v1377_v29 }
 0x122   :  { %1250 = vmatprep.subr.bf16.mxu1 %v1378_v30 }
 0x125   :  { %1251 = vmatpush3.bf16.msra.mxu1 %v1378_v30 }
 0x126   :  { %1252 = vmatprep.subr.bf16.mxu1 %v1379_v31 }
 0x129   :  { %1253 = vmatpush3.bf16.msra.mxu1 %v1379_v31 }
 0x12a   :  { %1254 = vmatprep.subr.bf16.mxu1 %v1380_v32 }
 0x12d   :  { %1255 = vmatpush3.bf16.msra.mxu1 %v1380_v32 }
 0x12e   :  { %1256 = vmatprep.subr.bf16.mxu1 %v1381_v33 }
 0x131   :  { %1257 = vmatpush3.bf16.msra.mxu1 %v1381_v33 }
 0x134   :  { %1259 = vmatmul.mubr.bf16.vlgmr.msra.gmra.mxu1 %v1383_v34 }
 0x135   :  { %1286 = vmatprep.mubr.msk.bf16.mxu1 %vm175_vm5, %v1665_v24 }
 0x1d4   :  { %v1240_v44 = vpop.f32.mrf.mxu1 }
 0x1d5   :  { %1416 = vrsqrt.f32 %v1240_v44  ;;  %vm233_vm6 = vcmp.gt.f32.partialorder %v1240_v44, 0.0 }
 0x1d6   :  { %v216_v45 = vpop.f32.mrf.mxu1 }
 0x1d7   :  { %vm231_vm9 = vcmp.gt.f32.partialorder %v216_v45, 0.0 }
 0x1d8   :  { %v1241_v46 = vpop.f32.mrf.mxu1 }
 0x1d9   :  { %1418 = vrsqrt.f32 %v1241_v46  ;;  %vm234_vm7 = vcmp.gt.f32.partialorder %v1241_v46, 0.0 }
 0x1da   :  { %1420 = vrsqrt.f32 %v216_v45  ;;  %v219_v47 = vpop.f32.mrf.mxu1 }
 0x1db   :  { %1422 = vrsqrt.f32 %v219_v47  ;;  %vm232_vm8 = vcmp.gt.f32.partialorder %v219_v47, 0.0 }
 0x1e2   :  { %v1417_v48 = vpop.eup %1416 }
 0x1e3   :  { %v241_v49 = vsel %vm233_vm6, %v1417_v48, 0.0 }
 0x1e4   :  { %518 = vperm.xlu0 %1370, %v241_v49  }
 0x1e6   :  { %v1419_v50 = vpop.eup %1418 }
 0x1e7   :  { %v1421_v51 = vpop.eup %1420  ;;  %v242_v52 = vsel %vm234_vm7, %v1419_v50, 0.0 }
 0x1e8   :  { %v1423_v53 = vpop.eup %1422  ;;  %523 = vperm.xlu1 %1371, %v242_v52   ;;  %v239_v55 = vsel %vm231_vm9, %v1421_v51, 0.0 }
 0x1e9   :  { %v240_v54 = vsel %vm232_vm8, %v1423_v53, 0.0 }
 0x1ea   :  { %513 = vperm.xlu0 %1370, %v240_v54  }
 0x1ec   :  { %508 = vperm.xlu1 %1371, %v239_v55  }
 0x1ee   :  { %1074 = vperm.xlu0 %1370, %v1064_v56  }
 0x1f0   :  { %1069 = vperm.xlu1 %1371, %v1063_v57  }
 0x1f2   :  { %1084 = vperm.xlu0 %1370, %v1066_v58  }
 0x1f4   :  { %v1260_v60 = vpop.f32.mrf.mxu1  ;;  %1079 = vperm.xlu1 %1371, %v1065_v59  }
 0x1f5   :  { %v373_v0 = vadd.f32 %v1260_v60, %v1120_v61 }
 0x1f6   :  { %v364_v62 = vpop.f32.mrf.mxu1 }
 0x1f7   :  { %v365_v63 = vadd.f32 %v1120_v61, %v364_v62  ;;  %v385_v7 = vmul.f32 0.01, %v373_v0  ;;  %vm381_vm12 = vcmp.gt.f32.partialorder %v373_v0, 0.0 }
 0x1f8   :  { %v1261_v1 = vpop.f32.mrf.mxu1 }
 0x1f9   :  { %v376_v2 = vadd.f32 %v1261_v1, %v1120_v61  ;;  %v383_v4 = vmul.f32 0.01, %v365_v63  ;;  %vm379_vm11 = vcmp.gt.f32.partialorder %v365_v63, 0.0  ;;  %v389_v13 = vsel %vm381_vm12, %v373_v0, %v385_v7  ;;  %v1400_v7 = vld [vmem:[#allocation7 + $0x38] sm:$0xff]  }
 0x1fa   :  { %v367_v3 = vpop.f32.mrf.mxu1 }
 0x1fb   :  { %vm382_vm10 = vcmp.gt.f32.partialorder %v376_v2, 0.0  ;;  %v386_v5 = vmul.f32 0.01, %v376_v2  ;;  %v368_v6 = vadd.f32 %v1120_v61, %v367_v3  ;;  %v387_v10 = vsel %vm379_vm11, %v365_v63, %v383_v4 }
 0x1fd   :  { %v384_v8 = vmul.f32 0.01, %v368_v6  ;;  %vm380_vm13 = vcmp.gt.f32.partialorder %v368_v6, 0.0  ;;  %v390_v9 = vsel %vm382_vm10, %v376_v2, %v386_v5 }
 0x1fe   :  { %v392_v14 = vpack.c.bf16 %v390_v9, %v389_v13  ;;  %v1402_v9 = vld [vmem:[#allocation7 + $0x28] sm:$0xff]  }
 0x1ff   :  { %v388_v11 = vsel %vm380_vm13, %v368_v6, %v384_v8  ;;  %v1401_v8 = vld [vmem:[#allocation7 + $0x30] sm:$0xff]   ;;  %v1406_v13 = vld [vmem:[#allocation7 + $0x8] sm:$0xff]  }
 0x200   :  { %v391_v12 = vpack.c.bf16 %v388_v11, %v387_v10  ;;  %v1403_v10 = vld [vmem:[#allocation7 + $0x20] sm:$0xff]   ;;  %v1404_v11 = vld [vmem:[#allocation7 + $0x18] sm:$0xff]  }
 0x202   :  { %1278 = vmatprep.mubr.bf16.mxu0 %v391_v12  ;;  %v1405_v12 = vld [vmem:[#allocation7 + $0x10] sm:$0xff]  }
 0x203   :  { %1279 = vmatmul.mubr.bf16.vlgmr.msra.gmra.mxu0 %v392_v14  ;;  %v1407_v14 = vld [vmem:[#allocation7] sm:$0xff]  }
 0x204   :  { %1291 = vmatpush3.bf16.msra.mxu0 %v1392_v15  ;;  %v1409_v15 = vld [vmem:[#allocation8 + $0x30] sm:$0xff]  }
 0x205   :  { %1292 = vmatprep.subr.bf16.mxu0 %v1393_v16 }
 0x208   :  { %1293 = vmatpush3.bf16.msra.mxu0 %v1393_v16  ;;  %v1410_v16 = vld [vmem:[#allocation8 + $0x28] sm:$0xff]  }
 0x209   :  { %1294 = vmatprep.subr.bf16.mxu0 %v1394_v17 }
 0x20c   :  { %1295 = vmatpush3.bf16.msra.mxu0 %v1394_v17  ;;  %v1411_v17 = vld [vmem:[#allocation8 + $0x20] sm:$0xff]  }
 0x20d   :  { %1296 = vmatprep.subr.bf16.mxu0 %v1395_v18 }
 0x210   :  { %1297 = vmatpush3.bf16.msra.mxu0 %v1395_v18  ;;  %v1412_v18 = vld [vmem:[#allocation8 + $0x18] sm:$0xff]  }
 0x211   :  { %1298 = vmatprep.subr.bf16.mxu0 %v1396_v35 }
 0x214   :  { %1299 = vmatpush3.bf16.msra.mxu0 %v1396_v35 }
 0x215   :  { %1300 = vmatprep.subr.bf16.mxu0 %v1397_v36 }
 0x218   :  { %1301 = vmatpush3.bf16.msra.mxu0 %v1397_v36 }
 0x219   :  { %1302 = vmatprep.subr.bf16.mxu0 %v1398_v37 }
 0x21c   :  { %1303 = vmatpush3.bf16.msra.mxu0 %v1398_v37 }
 0x21d   :  { %1304 = vmatprep.subr.bf16.mxu0 %v1399_v38 }
 0x220   :  { %1305 = vmatpush3.bf16.msra.mxu0 %v1399_v38 }
 0x25f   :  { %v1719_v21 = vpop.permute.xlu0 %518 }
 0x263   :  { %v1717_v19 = vpop.permute.xlu1 %523 }
 0x265   :  { %v1721_v25 = vpop.permute.xlu0 %513 }
 0x267   :  { %v1725_v29 = vpop.permute.xlu1 %508 }
 0x2c3   :  { %v1280_v20 = vpop.f32.mrf.mxu0 }
 0x2c4   :  { %v528_v26 = vmul.f32 %v1280_v20, %v1719_v21 }
 0x2c5   :  { %v491_v22 = vpop.f32.mrf.mxu0 }
 0x2c6   :  { %v526_v31 = vmul.f32 %v1725_v29, %v491_v22 }
 0x2c7   :  { %v1281_v23 = vpop.f32.mrf.mxu0 }
 0x2c8   :  { %v529_v28 = vmul.f32 %v1281_v23, %v1717_v19 }
 0x2c9   :  { %v494_v30 = vpop.f32.mrf.mxu0 }
 0x2ca   :  { %v531_v32 = vpack.c.bf16 %v529_v28, %v528_v26  ;;  %v527_v33 = vmul.f32 %v1721_v25, %v494_v30  ;;  %v1153_v28 = vld [vmem:[%s1770_s8 + $0x1] ss:$0 sm:$0xff] }
 0x2cc   :  { %v530_v34 = vpack.c.bf16 %v527_v33, %v526_v31  ;;  %1282 = vmatprep.subr.bf16.mxu1 %v531_v32 }
 0x2cd   :  { %1283 = vmatpush3.bf16.msra.mxu1 %v531_v32 }
 0x2ce   :  { %1284 = vmatprep.subr.bf16.mxu1 %v530_v34 }
 0x2d1   :  { %1285 = vmatpush3.bf16.msra.mxu1 %v530_v34 }
 0x2d4   :  { %1287 = vmatmul.mubr.msk.bf16.vlgmr.msra.gmra.mxu1 %vm175_vm5, %v1675_v27 }
 0x2d5   :  { %1314 = vmatprep.mubr.msk.bf16.mxu1 %vm175_vm5, %v1665_v24  ;;  %v1141_v24 = vld [vmem:[%s1770_s8] ss:$0 sm:$0xff] }
 0x394   :  { %v1288_v39 = vpop.f32.mrf.mxu1 }
 0x395   :  { %v583_v41 = vmul.f32 %v1288_v39, %v1719_v21 }
 0x396   :  { %v566_v40 = vpop.f32.mrf.mxu1 }
 0x397   :  { %v581_v42 = vmul.f32 %v566_v40, %v1725_v29  ;;  %v594_v47 = vadd.f32 %v1141_v24, %v583_v41 }
 0x398   :  { %v1289_v43 = vpop.f32.mrf.mxu1 }
 0x399   :  { %v584_v44 = vmul.f32 %v1289_v43, %v1717_v19  ;;  %v592_v45 = vadd.f32 %v1141_v24, %v581_v42  ;;  %v602_v53 = vmul.f32 0.01, %v594_v47  ;;  %vm598_vm0 = vcmp.gt.f32.partialorder %v594_v47, 0.0 }
 0x39a   :  { %v569_v46 = vpop.f32.mrf.mxu1 }
 0x39b   :  { %v595_v48 = vadd.f32 %v1141_v24, %v584_v44  ;;  %v582_v49 = vmul.f32 %v569_v46, %v1721_v25  ;;  %v600_v51 = vmul.f32 0.01, %v592_v45  ;;  %vm596_vm15 = vcmp.gt.f32.partialorder %v592_v45, 0.0  ;;  %v1413_v44 = vld [vmem:[#allocation8 + $0x10] sm:$0xff]  }
 0x39c   :  { %v606_v58 = vsel %vm598_vm0, %v594_v47, %v602_v53  ;;  %v1154_v47 = vld [vmem:[%s1772_s10] ss:$0 sm:$0xff] }
 0x39d   :  { %v603_v50 = vmul.f32 0.01, %v595_v48  ;;  %vm599_vm14 = vcmp.gt.f32.partialorder %v595_v48, 0.0  ;;  %v593_v52 = vadd.f32 %v1141_v24, %v582_v49  ;;  %v604_v56 = vsel %vm596_vm15, %v592_v45, %v600_v51  ;;  %v1415_v45 = vld [vmem:[#allocation8] sm:$0xff]  }
 0x39f   :  { %vm597_vm1 = vcmp.gt.f32.partialorder %v593_v52, 0.0  ;;  %v601_v54 = vmul.f32 0.01, %v593_v52  ;;  %v607_v55 = vsel %vm599_vm14, %v595_v48, %v603_v50 }
 0x3a0   :  { %v609_v60 = vpack.c.bf16 %v607_v55, %v606_v58 }
 0x3a1   :  { %v605_v57 = vsel %vm597_vm1, %v593_v52, %v601_v54 }
 0x3a2   :  { %v608_v59 = vpack.c.bf16 %v605_v57, %v604_v56 }
 0x3a4   :  { %1306 = vmatprep.mubr.bf16.mxu0 %v608_v59 }
 0x3a5   :  { %1307 = vmatmul.mubr.bf16.vlgmr.msra.gmra.mxu0 %v609_v60 }
 0x465   :  { %v1308_v61 = vpop.f32.mrf.mxu0 }
 0x466   :  { %v726_v0 = vmul.f32 %v1308_v61, %v1719_v21 }
 0x467   :  { %v709_v62 = vpop.f32.mrf.mxu0 }
 0x468   :  { %v724_v3 = vmul.f32 %v709_v62, %v1725_v29 }
 0x469   :  { %v1309_v63 = vpop.f32.mrf.mxu0 }
 0x46a   :  { %v727_v1 = vmul.f32 %v1309_v63, %v1717_v19 }
 0x46b   :  { %v712_v2 = vpop.f32.mrf.mxu0 }
 0x46c   :  { %v729_v4 = vpack.c.bf16 %v727_v1, %v726_v0  ;;  %v725_v5 = vmul.f32 %v712_v2, %v1721_v25  ;;  %v1070_v1 = vpop.permute.xlu1 %1069  ;;  %v1163_v2 = vld [vmem:[%s1774_s12] ss:$0 sm:$0xff]  ;;  %s1504_s12 = scalar_lea.vmem %s1101_s16, 512 }
 0x46d   :  { %p1505_p6 = scmp.ne.s32.totalorder %s1101_s16, %s1504_s12  ;;  %p1510_p8 = scmp.lt.s32.totalorder %s1504_s12, %s1504_s12 }
 0x46e   :  { %v728_v6 = vpack.c.bf16 %v725_v5, %v724_v3  ;;  %1310 = vmatprep.subr.bf16.mxu1 %v729_v4  ;;  %v1075_v3 = vpop.permute.xlu0 %1074 }
 0x46f   :  { %1311 = vmatpush3.bf16.msra.mxu1 %v729_v4  ;;  %p1511_p9 = por %p1510_p8, %p1509_p7 }
 0x470   :  { %1312 = vmatprep.subr.bf16.mxu1 %v728_v6 }
 0x471   :  { %p1512_p10 = pnand %p1511_p9, %p1505_p6 }
 0x473   :  { %1313 = vmatpush3.bf16.msra.mxu1 %v728_v6  ;;  %v1080_v6 = vpop.permute.xlu1 %1079 }
 0x474   :  { %1318 = vmatprep.subr.bf16.mxu1 %v1400_v7 }
 0x476   :  { %1315 = vmatmul.mubr.msk.bf16.vlgmr.msra.gmra.mxu1 %vm175_vm5, %v1675_v27  ;;  %v1408_v27 = vld [vmem:[#allocation8 + $0x38] sm:$0xff]  }
 0x477   :  { %1319 = vmatpush3.bf16.msra.mxu1 %v1400_v7  ;;  %1338 = vmatprep.subr.bf16.mxu0 %v1408_v27 }
 0x478   :  { %1320 = vmatprep.subr.bf16.mxu1 %v1401_v8  ;;  %1339 = vmatpush3.bf16.msra.mxu0 %v1408_v27 }
 0x479   :  { %1340 = vmatprep.subr.bf16.mxu0 %v1409_v15 }
 0x47b   :  { %1321 = vmatpush3.bf16.msra.mxu1 %v1401_v8 }
 0x47c   :  { %1322 = vmatprep.subr.bf16.mxu1 %v1402_v9  ;;  %1341 = vmatpush3.bf16.msra.mxu0 %v1409_v15 }
 0x47d   :  { %1342 = vmatprep.subr.bf16.mxu0 %v1410_v16 }
 0x47f   :  { %1323 = vmatpush3.bf16.msra.mxu1 %v1402_v9 }
 0x480   :  { %1324 = vmatprep.subr.bf16.mxu1 %v1403_v10  ;;  %1343 = vmatpush3.bf16.msra.mxu0 %v1410_v16 }
 0x481   :  { %1344 = vmatprep.subr.bf16.mxu0 %v1411_v17 }
 0x483   :  { %1325 = vmatpush3.bf16.msra.mxu1 %v1403_v10 }
 0x484   :  { %1326 = vmatprep.subr.bf16.mxu1 %v1404_v11  ;;  %1345 = vmatpush3.bf16.msra.mxu0 %v1411_v17 }
 0x485   :  { %1346 = vmatprep.subr.bf16.mxu0 %v1412_v18 }
 0x487   :  { %1327 = vmatpush3.bf16.msra.mxu1 %v1404_v11 }
 0x488   :  { %1328 = vmatprep.subr.bf16.mxu1 %v1405_v12  ;;  %1347 = vmatpush3.bf16.msra.mxu0 %v1412_v18 }
 0x489   :  { %1348 = vmatprep.subr.bf16.mxu0 %v1413_v44 }
 0x48b   :  { %1329 = vmatpush3.bf16.msra.mxu1 %v1405_v12 }
 0x48c   :  { %1330 = vmatprep.subr.bf16.mxu1 %v1406_v13  ;;  %1349 = vmatpush3.bf16.msra.mxu0 %v1413_v44 }
 0x48f   :  { %1331 = vmatpush3.bf16.msra.mxu1 %v1406_v13  ;;  %v1085_v13 = vpop.permute.xlu0 %1084 }
 0x490   :  { %1332 = vmatprep.subr.bf16.mxu1 %v1407_v14 }
 0x493   :  { %1333 = vmatpush3.bf16.msra.mxu1 %v1407_v14 }
 0x536   :  { %v1316_v20 = vpop.f32.mrf.mxu1 }
 0x537   :  { %v781_v23 = vmul.f32 %v1316_v20, %v1719_v21 }
 0x538   :  { %v764_v22 = vpop.f32.mrf.mxu1 }
 0x539   :  { %v779_v26 = vmul.f32 %v764_v22, %v1725_v29  ;;  %v793_v34 = vadd.f32 %v1153_v28, %v781_v23 }
 0x53a   :  { %v1317_v30 = vpop.f32.mrf.mxu1 }
 0x53b   :  { %v782_v31 = vmul.f32 %v1317_v30, %v1717_v19  ;;  %v791_v32 = vadd.f32 %v1153_v28, %v779_v26  ;;  %v801_v21 = vmul.f32 0.01, %v793_v34  ;;  %vm797_vm4 = vcmp.gt.f32.partialorder %v793_v34, 0.0 }
 0x53c   :  { %v767_v33 = vpop.f32.mrf.mxu1 }
 0x53d   :  { %v794_v35 = vadd.f32 %v1153_v28, %v782_v31  ;;  %v780_v36 = vmul.f32 %v767_v33, %v1721_v25  ;;  %v799_v38 = vmul.f32 0.01, %v791_v32  ;;  %vm795_vm3 = vcmp.gt.f32.partialorder %v791_v32, 0.0  ;;  %v1414_v25 = vld [vmem:[#allocation8 + $0x8] sm:$0xff]  }
 0x53e   :  { %v805_v24 = vsel %vm797_vm4, %v793_v34, %v801_v21  ;;  %1350 = vmatprep.subr.bf16.mxu0 %v1414_v25 }
 0x53f   :  { %v802_v37 = vmul.f32 0.01, %v794_v35  ;;  %vm798_vm2 = vcmp.gt.f32.partialorder %v794_v35, 0.0  ;;  %v792_v39 = vadd.f32 %v1153_v28, %v780_v36  ;;  %v803_v41 = vsel %vm795_vm3, %v791_v32, %v799_v38  ;;  %1351 = vmatpush3.bf16.msra.mxu0 %v1414_v25 }
 0x540   :  { %1352 = vmatprep.subr.bf16.mxu0 %v1415_v45 }
 0x541   :  { %vm796_vm5 = vcmp.gt.f32.partialorder %v792_v39, 0.0  ;;  %v800_v29 = vmul.f32 0.01, %v792_v39  ;;  %v806_v40 = vsel %vm798_vm2, %v794_v35, %v802_v37 }
 0x542   :  { %v808_v43 = vpack.c.bf16 %v806_v40, %v805_v24 }
 0x543   :  { %v804_v42 = vsel %vm796_vm5, %v792_v39, %v800_v29  ;;  %1353 = vmatpush3.bf16.msra.mxu0 %v1415_v45 }
 0x544   :  { %v807_v19 = vpack.c.bf16 %v804_v42, %v803_v41 }
 0x546   :  { %1334 = vmatprep.mubr.bf16.mxu1 %v807_v19 }
 0x547   :  { %1335 = vmatmul.mubr.bf16.vlgmr.msra.gmra.mxu1 %v808_v43 }
 0x607   :  { %v1336_v46 = vpop.f32.mrf.mxu1 }
 0x608   :  { %v923_v50 = vadd.f32 %v1336_v46, %v1154_v47 }
 0x609   :  { %v914_v48 = vpop.f32.mrf.mxu1 }
 0x60a   :  { %v915_v49 = vadd.f32 %v1154_v47, %v914_v48  ;;  %v935_v57 = vmul.f32 0.01, %v923_v50  ;;  %vm931_vm8 = vcmp.gt.f32.partialorder %v923_v50, 0.0 }
 0x60b   :  { %v1337_v51 = vpop.f32.mrf.mxu1 }
 0x60c   :  { %v926_v52 = vadd.f32 %v1337_v51, %v1154_v47  ;;  %v933_v54 = vmul.f32 0.01, %v915_v49  ;;  %vm929_vm7 = vcmp.gt.f32.partialorder %v915_v49, 0.0  ;;  %v939_v62 = vsel %vm931_vm8, %v923_v50, %v935_v57 }
 0x60d   :  { %v917_v53 = vpop.f32.mrf.mxu1 }
 0x60e   :  { %vm932_vm6 = vcmp.gt.f32.partialorder %v926_v52, 0.0  ;;  %v936_v55 = vmul.f32 0.01, %v926_v52  ;;  %v918_v56 = vadd.f32 %v1154_v47, %v917_v53  ;;  %v937_v60 = vsel %vm929_vm7, %v915_v49, %v933_v54 }
 0x610   :  { %vm930_vm9 = vcmp.gt.f32.partialorder %v918_v56, 0.0  ;;  %v934_v58 = vmul.f32 0.01, %v918_v56  ;;  %v940_v59 = vsel %vm932_vm6, %v926_v52, %v936_v55 }
 0x611   :  { %v942_v0 = vpack.c.bf16 %v940_v59, %v939_v62 }
 0x612   :  { %v938_v61 = vsel %vm930_vm9, %v918_v56, %v934_v58 }
 0x613   :  { %v941_v63 = vpack.c.bf16 %v938_v61, %v937_v60 }
 0x615   :  { %1354 = vmatprep.mubr.bf16.mxu0 %v941_v63 }
 0x616   :  { %1355 = vmatmul.mubr.bf16.vlgmr.msra.gmra.mxu0 %v942_v0 }
 0x6d6   :  { %v1356_v4 = vpop.f32.mrf.mxu0 }
 0x6d7   :  { %v1057_v5 = vadd.f32 %v1356_v4, %v1163_v2 }
 0x6d8   :  { %v1048_v7 = vpop.f32.mrf.mxu0 }
 0x6d9   :  { %v1089_v8 = vmul.f32 %v1080_v6, %v1057_v5  ;;  %v1049_v9 = vadd.f32 %v1163_v2, %v1048_v7 }
 0x6da   :  { %v1357_v10 = vpop.f32.mrf.mxu0 }
 0x6db   :  { %1093 = vst [vmem:[#allocation10 + $0x10] sm:$0xff] %v1089_v8  ;;  %v1087_v11 = vmul.f32 %v1070_v1, %v1049_v9  ;;  %v1060_v12 = vadd.f32 %v1357_v10, %v1163_v2 }
 0x6dc   :  { %v1051_v14 = vpop.f32.mrf.mxu0 }
 0x6dd   :  { %1091 = vst [vmem:[#allocation10] sm:$0xff] %v1087_v11  ;;  %v1090_v27 = vmul.f32 %v1085_v13, %v1060_v12  ;;  %v1052_v15 = vadd.f32 %v1163_v2, %v1051_v14 }
 0x6df   :  { %1094 = vst [vmem:[#allocation10 + $0x18] sm:$0xff] %v1090_v27  ;;  %v1088_v16 = vmul.f32 %v1075_v3, %v1052_v15 }
 0x6e1   :  { %1092 = vst [vmem:[#allocation10 + $0x8] sm:$0xff] %v1088_v16 }
 0x6e2   :  { %1515 = shalt.err (!%p1512_p10)
}
 0x6e3   :  { %s1542_s17 = smov 128   ;;  %s1543_s11 = smov 8  }
 0x6e4   :  { %1106 = dma.vmem_to_hbm [thread:$0]  %s1101_s16, 512, %s1775_s13, [#allocation4], %s1542_s17, %s1542_s17, %s1543_s11  }
 0x6e5   :  { %1530 = dma.done.wait [#allocation4], 512  }
 0x6e6   :  { %1531 = vsyncadd [#allocation4], 4294966784 }
 0x6e7   :  { %1110 = vsyncpa [#allocation3], 1 }
 0x6e8   :  { %1111 = vsyncpa [#allocation6], 1 }
 0x6e9   :  { %1112 = vsyncpa [#allocation9], 1 }
 0x6ea   :  { %1113 = vsyncpa [#allocation4], 1 }

</bundles_post_ra>
